<compile_context>
chip_gen: v5e
topology: v5e:2x2
jax: 0.10.0
libtpu: 0.0.40
codegen_flags: <defaults>
</compile_context>

<pallas_src>
import math

import jax
import jax.numpy as jnp
from jax.experimental import pallas as pl

B, T, D, DFF = 2, 8, 32, 64     # small shapes consistent with the module's forward
LANE = 128                      # pad feature dims to a full vreg lane width


def ffn_kernel(x_ref, w1_ref, b1_ref, w2_ref, b2_ref, o_ref):
    x = x_ref[...]                                                     # (B*T, 128) f32
    h = jnp.dot(x, w1_ref[...], preferred_element_type=jnp.float32) + b1_ref[...]
    h = jnp.maximum(h, 0.0)                                            # ReLU
    # TODO(synk): training-mode dropout (p=0.1) omitted; eval-mode forward only.
    o_ref[...] = (jnp.dot(h, w2_ref[...], preferred_element_type=jnp.float32)
                  + b2_ref[...]).astype(o_ref.dtype)


def positionwise_ffn(x, w1, b1, w2, b2):
    """x: (B, T, D); w1: (D, DFF); b1: (DFF,); w2: (DFF, D); b2: (D,).
    Weights use the (in, out) convention, i.e. PyTorch's linear.weight.T."""
    b, t, d = x.shape
    d_ff = w1.shape[1]
    n = b * t
    dp = max(LANE, d)
    fp = max(LANE, d_ff)

    # Wrapper-side layout plumbing: fuse (B, T) and zero-pad feature dims to 128.
    x_p = jnp.pad(x.reshape(n, d), ((0, 0), (0, dp - d)))
    w1_p = jnp.pad(w1, ((0, dp - d), (0, fp - d_ff)))
    b1_p = jnp.pad(b1.reshape(1, d_ff), ((0, 0), (0, fp - d_ff)))
    w2_p = jnp.pad(w2, ((0, fp - d_ff), (0, dp - d)))
    b2_p = jnp.pad(b2.reshape(1, d), ((0, 0), (0, dp - d)))

    # Single invocation, whole problem in VMEM: no grid, full-array blocks.
    out_p = pl.pallas_call(
        ffn_kernel,
        out_shape=jax.ShapeDtypeStruct((n, dp), jnp.float32),
    )(x_p, w1_p, b1_p, w2_p, b2_p)

    return out_p[:, :d].reshape(b, t, d)


if __name__ == "__main__":
    key = jax.random.PRNGKey(0)
    kx, k1, kb1, k2, kb2 = jax.random.split(key, 5)
    x = jax.random.normal(kx, (B, T, D), jnp.float32)
    w1 = jax.random.normal(k1, (D, DFF), jnp.float32) * (1.0 / math.sqrt(D))
    b1 = jax.random.normal(kb1, (DFF,), jnp.float32) * 0.01
    w2 = jax.random.normal(k2, (DFF, D), jnp.float32) * (1.0 / math.sqrt(DFF))
    b2 = jax.random.normal(kb2, (D,), jnp.float32) * 0.01

    out = jax.block_until_ready(positionwise_ffn(x, w1, b1, w2, b2))

    # Pure-JAX reference (dropout = identity in eval mode).
    ref = jnp.maximum(x @ w1 + b1, 0.0) @ w2 + b2
    assert out.shape == (B, T, D)
    assert bool(jnp.isfinite(out).all())
    assert bool(jnp.allclose(out, ref, atol=1e-4, rtol=1e-4))
    print("KERNEL_OK")
</pallas_src>

<mosaic_0001>
module attributes {stable_mosaic.version = 11 : i64} {
  func.func @ffn_kernel(%arg0: memref<16x128xf32, #tpu.memory_space<vmem>>, %arg1: memref<128x128xf32, #tpu.memory_space<vmem>>, %arg2: memref<1x128xf32, #tpu.memory_space<vmem>>, %arg3: memref<128x128xf32, #tpu.memory_space<vmem>>, %arg4: memref<1x128xf32, #tpu.memory_space<vmem>>, %arg5: memref<16x128xf32, #tpu.memory_space<vmem>>) attributes {dimension_semantics = [], scalar_prefetch = 0 : i64, scratch_operands = 0 : i64, tpu.core_type = #tpu.core_type<tc>} {
    %c0 = arith.constant 0 : index
    %c0_0 = arith.constant 0 : index
    %0 = vector.load %arg0[%c0, %c0_0] : memref<16x128xf32, #tpu.memory_space<vmem>>, vector<16x128xf32>
    %c0_1 = arith.constant 0 : index
    %c0_2 = arith.constant 0 : index
    %1 = vector.load %arg1[%c0_1, %c0_2] : memref<128x128xf32, #tpu.memory_space<vmem>>, vector<128x128xf32>
    %cst = arith.constant dense<0.000000e+00> : vector<16x128xf32>
    %2 = tpu.matmul %0, %1, %cst {dimension_numbers = #tpu.dot_dimension_numbers<[1], [0], [0], [1], [0, 0, 1, 1], [], []>} : vector<16x128xf32>, vector<128x128xf32>, vector<16x128xf32> -> vector<16x128xf32>
    %c0_3 = arith.constant 0 : index
    %c0_4 = arith.constant 0 : index
    %3 = vector.load %arg2[%c0_3, %c0_4] : memref<1x128xf32, #tpu.memory_space<vmem>>, vector<1x128xf32>
    %4 = vector.broadcast %3 : vector<1x128xf32> to vector<16x128xf32>
    %5 = arith.addf %2, %4 : vector<16x128xf32>
    %cst_5 = arith.constant 0.000000e+00 : f32
    %6 = vector.broadcast %cst_5 : f32 to vector<16x128xf32>
    %7 = arith.maximumf %5, %6 : vector<16x128xf32>
    %c0_6 = arith.constant 0 : index
    %c0_7 = arith.constant 0 : index
    %8 = vector.load %arg3[%c0_6, %c0_7] : memref<128x128xf32, #tpu.memory_space<vmem>>, vector<128x128xf32>
    %cst_8 = arith.constant dense<0.000000e+00> : vector<16x128xf32>
    %9 = tpu.matmul %7, %8, %cst_8 {dimension_numbers = #tpu.dot_dimension_numbers<[1], [0], [0], [1], [0, 0, 1, 1], [], []>} : vector<16x128xf32>, vector<128x128xf32>, vector<16x128xf32> -> vector<16x128xf32>
    %c0_9 = arith.constant 0 : index
    %c0_10 = arith.constant 0 : index
    %10 = vector.load %arg4[%c0_9, %c0_10] : memref<1x128xf32, #tpu.memory_space<vmem>>, vector<1x128xf32>
    %11 = vector.broadcast %10 : vector<1x128xf32> to vector<16x128xf32>
    %12 = arith.addf %9, %11 : vector<16x128xf32>
    %c0_11 = arith.constant 0 : index
    %c0_12 = arith.constant 0 : index
    %13 = vector.load %arg5[%c0_11, %c0_12] : memref<16x128xf32, #tpu.memory_space<vmem>>, vector<16x128xf32>
    tpu.vector_store %arg5[%c0_11, %c0_12], %12 {strides = array<i32>} : memref<16x128xf32, #tpu.memory_space<vmem>>, vector<16x128xf32>,
    return
  }
}

</mosaic_0001>

<bundles_post_ra>
// kernel: tpu_custom_call.1
= control target key start
LH: loop header
LB: loop body
LE: loop exit
PB: predicated region body
PF: predicated region fallthrough
CT: control target
= control target key end

     0   :  { %10 = vsyncpa [#allocation3], 0  ;;  %s388_s0 = inlined_call_operand.hbm [shape: f32[16,128], index: 0, kind: input, shape index: {}]   ;;  %s389_s1 = inlined_call_operand.hbm [shape: f32[128,128], index: 1, kind: input, shape index: {}]   ;;  %s390_s2 = inlined_call_operand.vmem [shape: f32[1,128], index: 2, kind: input, shape index: {}]   ;;  %s391_s3 = inlined_call_operand.hbm [shape: f32[128,128], index: 3, kind: input, shape index: {}]   ;;  %s392_s4 = inlined_call_operand.vmem [shape: f32[1,128], index: 4, kind: input, shape index: {}]   ;;  %s393_s5 = inlined_call_operand.hbm [shape: f32[16,128], index: 5, kind: output, shape index: {}]  }
   0x1   :  { %11 = vsyncpa [#allocation6], 0 }
   0x2   :  { %12 = vsyncpa [#allocation4], 0  ;;  %s30_s20 = sshll.u32 %s389_s1, 4  ;;  %s322_s21 = smov [#allocation5]   ;;  %s31_s20 = int_to_ptr.hbm [resolvable:$true] %s30_s20 }
   0x3   :  { %s32_s22 = sshll.u32 %s322_s21, 4  ;;  %s17_s25 = sshll.u32 %s388_s0, 4  ;;  %s33_s22 = int_to_ptr.vmem [resolvable:$true] %s32_s22  ;;  %s18_s25 = int_to_ptr.hbm [resolvable:$true] %s17_s25 }
   0x4   :  { %s323_s26 = smov 128   ;;  %s324_s27 = smov 8  }
   0x5   :  { %38 = dma.hbm_to_vmem [thread:$0]  %s31_s20, 2048, %s33_s22, [#allocation6], %s323_s26, %s323_s26, %s324_s27  }
   0x6   :  { %s325_s28 = smov [#allocation2]   ;;  %s45_s1 = sshll.u32 %s391_s3, 4  ;;  %s46_s1 = int_to_ptr.hbm [resolvable:$true] %s45_s1 }
   0x7   :  { %s19_s29 = sshll.u32 %s325_s28, 4  ;;  %s326_s0 = smov [#allocation7]   ;;  %s20_s29 = int_to_ptr.vmem [resolvable:$true] %s19_s29 }
   0x8   :  { %25 = dma.hbm_to_vmem [thread:$0]  %s18_s25, 256, %s20_s29, [#allocation3], %s323_s26, %s323_s26, %s324_s27  }
   0x9   :  { %s47_s7 = sshll.u32 %s326_s0, 4  ;;  %s48_s7 = int_to_ptr.vmem [resolvable:$true] %s47_s7 }
   0xa   :  { %53 = dma.hbm_to_vmem [thread:$0]  %s46_s1, 2048, %s48_s7, [#allocation6], %s323_s26, %s323_s26, %s324_s27  }
   0xb   :  { %316 = dma.done.wait [#allocation3], 256  }
   0xc   :  { %317 = vsyncadd [#allocation3], 4294967040 }
   0xd   :  { %318 = dma.done.wait [#allocation6], 4096  }
   0xe   :  { %319 = vsyncadd [#allocation6], 4294963200  ;;  %v85_v0 = vld [vmem:[#allocation5 + $0x78] sm:$0xff]  ;;  %v84_v1 = vld [vmem:[#allocation5 + $0x70] sm:$0xff]  ;;  %s327_s11 = smov [#allocation8]  }
   0xf   :  { %180 = vmatpush.msra.mxu2 %v85_v0  ;;  %90 = vmatpush.msra.mxu0 %v85_v0  ;;  %v83_v2 = vld [vmem:[#allocation5 + $0x68] sm:$0xff]  ;;  %v82_v3 = vld [vmem:[#allocation5 + $0x60] sm:$0xff]  ;;  %v81_v4 = vld [vmem:[#allocation5 + $0x58] sm:$0xff]  ;;  %s164_s12 = sshll.u32 %s327_s11, 4  ;;  %s165_s12 = int_to_ptr.vmem [resolvable:$true] %s164_s12 }
  0x10   :  { %v130_v5 = vld [vmem:[#allocation7 + $0x78] sm:$0xff]  ;;  %v129_v6 = vld [vmem:[#allocation7 + $0x70] sm:$0xff]  ;;  %v128_v8 = vld [vmem:[#allocation7 + $0x68] sm:$0xff] }
  0x11   :  { %181 = vmatpush.msra.mxu2 %v84_v1  ;;  %91 = vmatpush.msra.mxu0 %v84_v1  ;;  %v80_v7 = vld [vmem:[#allocation5 + $0x50] sm:$0xff]  ;;  %v79_v9 = vld [vmem:[#allocation5 + $0x48] sm:$0xff]  ;;  %v127_v10 = vld [vmem:[#allocation7 + $0x60] sm:$0xff] }
  0x12   :  { %196 = vmatpush.msra.mxu3 %v130_v5  ;;  %135 = vmatpush.msra.mxu1 %v130_v5  ;;  %v78_v11 = vld [vmem:[#allocation5 + $0x40] sm:$0xff]  ;;  %v126_v12 = vld [vmem:[#allocation7 + $0x58] sm:$0xff]  ;;  %v125_v14 = vld [vmem:[#allocation7 + $0x50] sm:$0xff] }
  0x13   :  { %182 = vmatpush.msra.mxu2 %v83_v2  ;;  %92 = vmatpush.msra.mxu0 %v83_v2  ;;  %v77_v13 = vld [vmem:[#allocation5 + $0x38] sm:$0xff]  ;;  %v76_v15 = vld [vmem:[#allocation5 + $0x30] sm:$0xff]  ;;  %v124_v16 = vld [vmem:[#allocation7 + $0x48] sm:$0xff] }
  0x14   :  { %197 = vmatpush.msra.mxu3 %v129_v6  ;;  %136 = vmatpush.msra.mxu1 %v129_v6  ;;  %v75_v17 = vld [vmem:[#allocation5 + $0x28] sm:$0xff]  ;;  %v123_v18 = vld [vmem:[#allocation7 + $0x40] sm:$0xff]  ;;  %v122_v20 = vld [vmem:[#allocation7 + $0x38] sm:$0xff] }
  0x15   :  { %183 = vmatpush.msra.mxu2 %v82_v3  ;;  %93 = vmatpush.msra.mxu0 %v82_v3  ;;  %v74_v19 = vld [vmem:[#allocation5 + $0x20] sm:$0xff]  ;;  %v73_v21 = vld [vmem:[#allocation5 + $0x18] sm:$0xff]  ;;  %v121_v22 = vld [vmem:[#allocation7 + $0x30] sm:$0xff] }
  0x16   :  { %198 = vmatpush.msra.mxu3 %v128_v8  ;;  %137 = vmatpush.msra.mxu1 %v128_v8  ;;  %v72_v23 = vld [vmem:[#allocation5 + $0x10] sm:$0xff]  ;;  %v120_v24 = vld [vmem:[#allocation7 + $0x28] sm:$0xff]  ;;  %v119_v26 = vld [vmem:[#allocation7 + $0x20] sm:$0xff] }
  0x17   :  { %184 = vmatpush.msra.mxu2 %v81_v4  ;;  %94 = vmatpush.msra.mxu0 %v81_v4  ;;  %v71_v25 = vld [vmem:[#allocation5 + $0x8] sm:$0xff]  ;;  %v70_v27 = vld [vmem:[#allocation5] sm:$0xff]  ;;  %v69_v28 = vld [vmem:[#allocation2 + $0x8] sm:$0xff] }
  0x18   :  { %199 = vmatpush.msra.mxu3 %v127_v10  ;;  %138 = vmatpush.msra.mxu1 %v127_v10  ;;  %v68_v29 = vld [vmem:[#allocation2] sm:$0xff]  ;;  %v118_v30 = vld [vmem:[#allocation7 + $0x18] sm:$0xff]  ;;  %v116_v32 = vld [vmem:[#allocation7 + $0x8] sm:$0xff] }
  0x19   :  { %185 = vmatpush.msra.mxu2 %v80_v7  ;;  %95 = vmatpush.msra.mxu0 %v80_v7  ;;  %v117_v31 = vld [vmem:[#allocation7 + $0x10] sm:$0xff]  ;;  %v115_v33 = vld [vmem:[#allocation7] sm:$0xff] }
  0x1a   :  { %200 = vmatpush.msra.mxu3 %v126_v12  ;;  %139 = vmatpush.msra.mxu1 %v126_v12  ;;  %v218_v34 = vld [vmem:[%s390_s2] ss:$0 sm:$0xff]  ;;  %s166_s2 = sshll.u32 %s393_s5, 4  ;;  %s167_s2 = int_to_ptr.hbm [resolvable:$true] %s166_s2 }
  0x1b   :  { %186 = vmatpush.msra.mxu2 %v79_v9  ;;  %96 = vmatpush.msra.mxu0 %v79_v9  ;;  %v219_v41 = vld [vmem:[%s392_s4] ss:$0 sm:$0xff] }
  0x1c   :  { %201 = vmatpush.msra.mxu3 %v125_v14  ;;  %140 = vmatpush.msra.mxu1 %v125_v14 }
  0x1d   :  { %187 = vmatpush.msra.mxu2 %v78_v11  ;;  %97 = vmatpush.msra.mxu0 %v78_v11 }
  0x1e   :  { %202 = vmatpush.msra.mxu3 %v124_v16  ;;  %141 = vmatpush.msra.mxu1 %v124_v16 }
  0x1f   :  { %188 = vmatpush.msra.mxu2 %v77_v13  ;;  %98 = vmatpush.msra.mxu0 %v77_v13 }
  0x20   :  { %203 = vmatpush.msra.mxu3 %v123_v18  ;;  %142 = vmatpush.msra.mxu1 %v123_v18 }
  0x21   :  { %189 = vmatpush.msra.mxu2 %v76_v15  ;;  %99 = vmatpush.msra.mxu0 %v76_v15 }
  0x22   :  { %204 = vmatpush.msra.mxu3 %v122_v20  ;;  %143 = vmatpush.msra.mxu1 %v122_v20 }
  0x23   :  { %190 = vmatpush.msra.mxu2 %v75_v17  ;;  %100 = vmatpush.msra.mxu0 %v75_v17 }
  0x24   :  { %205 = vmatpush.msra.mxu3 %v121_v22  ;;  %144 = vmatpush.msra.mxu1 %v121_v22 }
  0x25   :  { %191 = vmatpush.msra.mxu2 %v74_v19  ;;  %101 = vmatpush.msra.mxu0 %v74_v19 }
  0x26   :  { %206 = vmatpush.msra.mxu3 %v120_v24  ;;  %145 = vmatpush.msra.mxu1 %v120_v24 }
  0x27   :  { %192 = vmatpush.msra.mxu2 %v73_v21  ;;  %102 = vmatpush.msra.mxu0 %v73_v21 }
  0x28   :  { %207 = vmatpush.msra.mxu3 %v119_v26  ;;  %146 = vmatpush.msra.mxu1 %v119_v26 }
  0x29   :  { %193 = vmatpush.msra.mxu2 %v72_v23  ;;  %103 = vmatpush.msra.mxu0 %v72_v23 }
  0x2a   :  { %208 = vmatpush.msra.mxu3 %v118_v30  ;;  %147 = vmatpush.msra.mxu1 %v118_v30 }
  0x2b   :  { %194 = vmatpush.msra.mxu2 %v71_v25  ;;  %104 = vmatpush.msra.mxu0 %v71_v25 }
  0x2c   :  { %209 = vmatpush.msra.mxu3 %v117_v31  ;;  %148 = vmatpush.msra.mxu1 %v117_v31 }
  0x2d   :  { %195 = vmatpush.msra.mxu2 %v70_v27  ;;  %105 = vmatpush.msra.mxu0 %v70_v27 }
  0x2e   :  { %109 = vmatmul.f32.vlgmr.msra.gmra.mxu2 %v69_v28  ;;  %106 = vmatmul.f32.vlgmr.msra.gmra.mxu0 %v68_v29 }
  0x2f   :  { %210 = vmatpush.msra.mxu3 %v116_v32  ;;  %149 = vmatpush.msra.mxu1 %v116_v32 }
  0x31   :  { %211 = vmatpush.msra.mxu3 %v115_v33  ;;  %150 = vmatpush.msra.mxu1 %v115_v33 }
  0xab   :  { %v107_v35 = vpop.f32.mrf.mxu0 }
  0xac   :  { %v108_v36 = vadd.f32 %v218_v34, %v107_v35 }
  0xae   :  { %v113_v37 = vmax.f32 %v108_v36, 0.0 }
  0xb0   :  { %151 = vmatmul.f32.vlgmr.msra.gmra.mxu1 %v113_v37 }
  0xb1   :  { %v110_v38 = vpop.f32.mrf.mxu2 }
  0xb2   :  { %v111_v39 = vadd.f32 %v218_v34, %v110_v38 }
  0xb4   :  { %v114_v40 = vmax.f32 %v111_v39, 0.0 }
  0xb6   :  { %154 = vmatmul.f32.vlgmr.msra.gmra.mxu3 %v114_v40 }
 0x12d   :  { %v152_v42 = vpop.f32.mrf.mxu1 }
 0x12e   :  { %v153_v43 = vadd.f32 %v219_v41, %v152_v42 }
 0x130   :  { %158 = vst [vmem:[#allocation8] sm:$0xff] %v153_v43 }
 0x139   :  { %v155_v44 = vpop.f32.mrf.mxu3 }
 0x13a   :  { %v156_v45 = vadd.f32 %v219_v41, %v155_v44 }
 0x13c   :  { %159 = vst [vmem:[#allocation8 + $0x8] sm:$0xff] %v156_v45 }
 0x13d   :  { %172 = dma.vmem_to_hbm [thread:$0]  %s165_s12, 256, %s167_s2, [#allocation4], %s323_s26, %s323_s26, %s324_s27  }
 0x13e   :  { %320 = dma.done.wait [#allocation4], 256  }
 0x13f   :  { %321 = vsyncadd [#allocation4], 4294967040 }
 0x140   :  { %177 = vsyncpa [#allocation3], 1 }
 0x141   :  { %178 = vsyncpa [#allocation6], 1 }
 0x142   :  { %179 = vsyncpa [#allocation4], 1 }

</bundles_post_ra>
